<compile_context>
chip_gen: v5e
topology: v5e:2x2
jax: 0.10.0
libtpu: 0.0.40
codegen_flags: <defaults>
</compile_context>

<pallas_src>
import functools

import jax
import jax.numpy as jnp
from jax.experimental import pallas as pl
from jax.experimental.pallas import tpu as pltpu

EPS = 1e-6


def _round_up(n, m):
    return (n + m - 1) // m * m


def _vmem_budget_bytes():
    """~90% of the real per-core VMEM capacity (v5e/v6e: 128 MiB, v7x: 64 MiB)."""
    try:
        cap = int(pltpu.get_tpu_info().vmem_capacity_bytes)
    except Exception:
        cap = 64 << 20  # conservative fallback: v7x per-TensorCore capacity
    return int(cap * 0.9)


def _invariant_spec(shape, index_map, single_buffer):
    """BlockSpec for a grid-invariant operand.

    The default pipeliner allocates 2 buffers per input; for operands whose
    index_map is constant that second buffer is pure VMEM waste (the D x D
    weight in particular), so request a single buffer when allowed.
    """
    if single_buffer:
        return pl.BlockSpec(shape, index_map, pipeline_mode=pl.Buffered(1))
    return pl.BlockSpec(shape, index_map)


# ---------------------------------------------------------------------------
# Kernels
# ---------------------------------------------------------------------------
def _fused_kernel(x_ref, a2_ref, b2_ref, w_ref, bsub_ref, o_ref, *, feat):
    # x_ref:    (tm, D) rows of the flattened input.  The ragged last row tile
    #           may contain stale VMEM rows; their outputs are masked on store.
    # a2/b2:    (1, D) layernorm scale / bias;  bsub_ref: (1, D) Linear bias.
    # w_ref:    (D, D) Linear weight (applied as normed @ W), resident in VMEM.
    x = x_ref[...].astype(jnp.float32)

    # LayerNorm (torch semantics: unbiased std, eps added to the std).
    mean = jnp.sum(x, axis=-1, keepdims=True) * (1.0 / feat)
    centered = x - mean
    var = jnp.sum(centered * centered, axis=-1, keepdims=True) * (1.0 / (feat - 1))
    inv_std = pl.reciprocal(jnp.sqrt(var) + EPS, approx=False)  # EUP, not VALU
    normed = (a2_ref[...] * (centered * inv_std) + b2_ref[...]).astype(w_ref.dtype)

    # Sublayer: Linear(size, size) on the MXU with f32 accumulation.
    sub = jnp.dot(normed, w_ref[...], preferred_element_type=jnp.float32)
    sub = sub + bsub_ref[...]

    # Dropout: eval mode -> identity.
    # TODO(synk): training-mode dropout would need pltpu.prng_seed +
    # pltpu.prng_random_bits to build a Bernoulli mask in-kernel.

    # Residual: re-read x from VMEM instead of holding the f32 copy across
    # the matmul (shorter live ranges -> less spill pressure).
    o_ref[...] = (x_ref[...].astype(jnp.float32) + sub).astype(o_ref.dtype)


def _col_tiled_kernel(x_ref, a2_ref, b2_ref, w_ref, bsub_ref, o_ref,
                      normed_ref, *, feat, tn):
    # Grid: (row tiles, column tiles); columns innermost ("arbitrary").
    # x_ref:      (tm, D)  full-width rows, resident across the column axis.
    # w_ref:      (D, tn)  column slice of the Linear weight.
    # bsub_ref:   (1, tn)  column slice of the Linear bias.
    # o_ref:      (tm, tn) output block.
    # normed_ref: (tm, D)  VMEM scratch with LayerNorm(x) for this row tile.
    j = pl.program_id(1)

    @pl.when(j == 0)
    def _():
        x = x_ref[...].astype(jnp.float32)
        mean = jnp.sum(x, axis=-1, keepdims=True) * (1.0 / feat)
        centered = x - mean
        var = jnp.sum(centered * centered, axis=-1, keepdims=True) * (1.0 / (feat - 1))
        inv_std = pl.reciprocal(jnp.sqrt(var) + EPS, approx=False)
        normed_ref[...] = (a2_ref[...] * (centered * inv_std)
                           + b2_ref[...]).astype(normed_ref.dtype)

    sub = jnp.dot(normed_ref[...], w_ref[...], preferred_element_type=jnp.float32)
    sub = sub + bsub_ref[...]

    col0 = pl.multiple_of(j * tn, tn)   # lane offset is a multiple of 128
    o_ref[...] = (x_ref[:, pl.ds(col0, tn)].astype(jnp.float32)
                  + sub).astype(o_ref.dtype)


# ---------------------------------------------------------------------------
# Wrapper
# ---------------------------------------------------------------------------
def _sublayer_connection(x, a2, b2, w, bsub, *, mxu_dtype, max_tile_rows,
                         col_tile, force_column_tiling,
                         single_buffer_invariants):
    B, T, D = x.shape
    assert D > 1, "unbiased std requires at least 2 features"
    N = B * T

    x2d = x.reshape(N, D)
    a2_2d = a2.reshape(1, D).astype(jnp.float32)
    b2_2d = b2.reshape(1, D).astype(jnp.float32)
    bsub_2d = bsub.reshape(1, D).astype(jnp.float32)
    w_mxu = w.astype(mxu_dtype)

    x_bytes = x.dtype.itemsize
    w_bytes = jnp.dtype(mxu_dtype).itemsize
    row_align = 16 if x.dtype == jnp.bfloat16 else 8
    tm_cap = _round_up(N, row_align)
    budget = _vmem_budget_bytes()

    def pick_tm(fixed_bytes, per_row_bytes):
        tm = min(_round_up(max_tile_rows, row_align), tm_cap)
        while tm > row_align and fixed_bytes + tm * per_row_bytes > budget:
            tm = _round_up(tm // 2, row_align)
        return tm, (fixed_bytes + tm * per_row_bytes <= budget)

    cost = pl.CostEstimate(
        flops=int(2 * N * D * D + 10 * N * D),
        transcendentals=int(2 * N),  # sqrt + reciprocal per row
        bytes_accessed=int(2 * N * D * x_bytes + D * D * w_bytes + 3 * D * 4))

    # --- Path 1: resident D x D weight, single grid axis over rows. --------
    # Per-row VMEM: x tile (2 buffers) + out tile (2 buffers) + ~5 f32
    # temporaries (x, centered, normed, sub, ...) held around the matmul.
    fused_fixed = D * D * w_bytes * (1 if single_buffer_invariants else 2) \
        + 3 * D * 4 + (1 << 20)
    fused_per_row = 2 * D * x_bytes + 2 * D * x_bytes + 5 * D * 4
    tm, fused_fits = pick_tm(fused_fixed, fused_per_row)

    use_tiled = (force_column_tiling or not fused_fits) and (D % 128 == 0)
    # TODO(synk): if the weight doesn't fit VMEM and D % 128 != 0 we still run
    # the fused path (compiler may spill); real transformer widths are
    # multiples of 128 so the column-tiled path covers the large-D case.

    if not use_tiled:
        grid = (pl.cdiv(N, tm),)
        out = pl.pallas_call(
            functools.partial(_fused_kernel, feat=D),
            out_shape=jax.ShapeDtypeStruct((N, D), x.dtype),
            grid_spec=pltpu.PrefetchScalarGridSpec(
                num_scalar_prefetch=0,
                grid=grid,
                in_specs=[
                    pl.BlockSpec((tm, D), lambda i: (i, 0)),   # x rows (streamed)
                    _invariant_spec((1, D), lambda i: (0, 0),
                                    single_buffer_invariants),  # a_2
                    _invariant_spec((1, D), lambda i: (0, 0),
                                    single_buffer_invariants),  # b_2
                    _invariant_spec((D, D), lambda i: (0, 0),
                                    single_buffer_invariants),  # W (resident)
                    _invariant_spec((1, D), lambda i: (0, 0),
                                    single_buffer_invariants),  # Linear bias
                ],
                out_specs=pl.BlockSpec((tm, D), lambda i: (i, 0)),
            ),
            compiler_params=pltpu.CompilerParams(
                dimension_semantics=("parallel",),
                vmem_limit_bytes=budget),
            cost_estimate=cost,
        )(x2d, a2_2d, b2_2d, w_mxu, bsub_2d)
        return out.reshape(B, T, D)

    # --- Path 2: column-tiled weight for large D (e.g. v7x 64 MiB VMEM). ---
    tn = max(128, (min(col_tile, D) // 128) * 128)
    while D % tn != 0:        # keep the dynamic column slice in-bounds
        tn -= 128

    tiled_fixed = 2 * D * tn * w_bytes + 3 * D * 4 + (1 << 20)
    tiled_per_row = (2 * D * x_bytes        # x tile, 2 buffers
                     + 2 * tn * x_bytes     # out tile, 2 buffers
                     + D * w_bytes          # normed scratch
                     + 5 * D * 4)           # f32 temporaries under j == 0
    tm, _ = pick_tm(tiled_fixed, tiled_per_row)

    grid = (pl.cdiv(N, tm), D // tn)
    out = pl.pallas_call(
        functools.partial(_col_tiled_kernel, feat=D, tn=tn),
        out_shape=jax.ShapeDtypeStruct((N, D), x.dtype),
        grid_spec=pltpu.PrefetchScalarGridSpec(
            num_scalar_prefetch=0,
            grid=grid,
            in_specs=[
                pl.BlockSpec((tm, D), lambda i, j: (i, 0)),   # x rows, full width
                _invariant_spec((1, D), lambda i, j: (0, 0),
                                single_buffer_invariants),    # a_2
                _invariant_spec((1, D), lambda i, j: (0, 0),
                                single_buffer_invariants),    # b_2
                pl.BlockSpec((D, tn), lambda i, j: (0, j)),   # W column slice
                pl.BlockSpec((1, tn), lambda i, j: (0, j)),   # bias column slice
            ],
            out_specs=pl.BlockSpec((tm, tn), lambda i, j: (i, j)),
            scratch_shapes=[pltpu.VMEM((tm, D), mxu_dtype)],  # LayerNorm(x) cache
        ),
        compiler_params=pltpu.CompilerParams(
            dimension_semantics=("parallel", "arbitrary"),
            vmem_limit_bytes=budget),
        cost_estimate=cost,
    )(x2d, a2_2d, b2_2d, w_mxu, bsub_2d)
    return out.reshape(B, T, D)


def sublayer_connection(x, a2, b2, w, bsub, *, mxu_dtype=jnp.bfloat16,
                        max_tile_rows=1024, col_tile=512,
                        force_column_tiling=False):
    """x: (B, T, D).  Returns x + Linear(LayerNorm(x)) (eval-mode dropout)."""
    try:
        return _sublayer_connection(
            x, a2, b2, w, bsub, mxu_dtype=mxu_dtype,
            max_tile_rows=max_tile_rows, col_tile=col_tile,
            force_column_tiling=force_column_tiling,
            single_buffer_invariants=True)
    except Exception:
        # pl.Buffered(1) on the invariant operands is purely a VMEM saving; if
        # this jax build rejects pipeline_mode, retry with default buffering.
        # (Genuine kernel errors will simply re-raise from the retry.)
        return _sublayer_connection(
            x, a2, b2, w, bsub, mxu_dtype=mxu_dtype,
            max_tile_rows=max_tile_rows, col_tile=col_tile,
            force_column_tiling=force_column_tiling,
            single_buffer_invariants=False)


# ---------------------------------------------------------------------------
# Reference + demo
# ---------------------------------------------------------------------------
def reference(x, a2, b2, w, bsub):
    xf = x.astype(jnp.float32)
    mean = jnp.mean(xf, axis=-1, keepdims=True)
    c = xf - mean
    std = jnp.sqrt(jnp.sum(c * c, axis=-1, keepdims=True) / (x.shape[-1] - 1))
    normed = a2 * c / (std + EPS) + b2
    sub = normed @ w + bsub
    return (xf + sub).astype(x.dtype)


if __name__ == "__main__":
    key = jax.random.PRNGKey(0)

    # --- Test 1: default path (bf16 MXU, resident weight, ragged row grid) --
    B, T, D = 2, 8, 32
    k1, k2, k3, key = jax.random.split(key, 4)
    x = jax.random.normal(k1, (B, T, D), dtype=jnp.float32)
    a2 = jnp.ones((D,), dtype=jnp.float32)      # LayerNorm init: ones / zeros
    b2 = jnp.zeros((D,), dtype=jnp.float32)
    w = jax.random.normal(k2, (D, D), dtype=jnp.float32) * 0.02
    bsub = jax.random.normal(k3, (D,), dtype=jnp.float32) * 0.02

    out = jax.block_until_ready(sublayer_connection(x, a2, b2, w, bsub))
    ref = reference(x, a2, b2, w, bsub)
    assert out.shape == (B, T, D)
    # bf16 MXU path -> relaxed tolerance.
    assert jnp.allclose(out, ref, atol=1e-2, rtol=1e-2), "bf16 path mismatch"

    # --- Test 2: column-tiled path (forced), f32 MXU for a strict check -----
    B2, T2, D2 = 2, 8, 256
    k1, k2, k3, key = jax.random.split(key, 4)
    x2 = jax.random.normal(k1, (B2, T2, D2), dtype=jnp.float32)
    a22 = 1.0 + 0.1 * jax.random.normal(k2, (D2,), dtype=jnp.float32)
    b22 = 0.1 * jax.random.normal(k3, (D2,), dtype=jnp.float32)
    k1, k2, key = jax.random.split(key, 3)
    w2 = jax.random.normal(k1, (D2, D2), dtype=jnp.float32) * 0.02
    bsub2 = jax.random.normal(k2, (D2,), dtype=jnp.float32) * 0.02

    out2 = jax.block_until_ready(
        sublayer_connection(x2, a22, b22, w2, bsub2, mxu_dtype=jnp.float32,
                            force_column_tiling=True, col_tile=128))
    ref2 = reference(x2, a22, b22, w2, bsub2)
    assert out2.shape == (B2, T2, D2)
    assert jnp.allclose(out2, ref2, atol=1e-3, rtol=1e-3), "tiled path mismatch"

    print("KERNEL_OK")
</pallas_src>

<mosaic_0001>
module attributes {stable_mosaic.version = 11 : i64} {
  func.func @_fused_kernel(%arg0: i32, %arg1: memref<16x32xf32, #tpu.memory_space<vmem>>, %arg2: memref<1x32xf32, #tpu.memory_space<vmem>>, %arg3: memref<1x32xf32, #tpu.memory_space<vmem>>, %arg4: memref<32x32xbf16, #tpu.memory_space<vmem>>, %arg5: memref<1x32xf32, #tpu.memory_space<vmem>>, %arg6: memref<16x32xf32, #tpu.memory_space<vmem>>) attributes {dimension_semantics = [#tpu.dimension_semantics<parallel>], iteration_bounds = array<i64: 1>, scalar_prefetch = 0 : i64, scratch_operands = 0 : i64, tpu.core_type = #tpu.core_type<tc>, window_params = [{transform_indices = @transform_0, window_bounds = array<i64: 16, 32>}, {pipeline_mode = #tpu.pipeline_mode<synchronous>, transform_indices = @transform_1, window_bounds = array<i64: 1, 32>}, {pipeline_mode = #tpu.pipeline_mode<synchronous>, transform_indices = @transform_2, window_bounds = array<i64: 1, 32>}, {pipeline_mode = #tpu.pipeline_mode<synchronous>, transform_indices = @transform_3, window_bounds = array<i64: 32, 32>}, {pipeline_mode = #tpu.pipeline_mode<synchronous>, transform_indices = @transform_4, window_bounds = array<i64: 1, 32>}, {transform_indices = @transform_5, window_bounds = array<i64: 16, 32>}]} {
    %c0 = arith.constant 0 : index
    %c0_0 = arith.constant 0 : index
    %0 = vector.load %arg1[%c0, %c0_0] : memref<16x32xf32, #tpu.memory_space<vmem>>, vector<16x32xf32>
    %cst = arith.constant dense<0.000000e+00> : vector<16xf32>
    %1 = vector.multi_reduction <add>, %0, %cst [1] : vector<16x32xf32> to vector<16xf32>
    %2 = vector.shape_cast %1 : vector<16xf32> to vector<16x1xf32>
    %cst_1 = arith.constant 3.125000e-02 : f32
    %3 = vector.broadcast %cst_1 : f32 to vector<16x1xf32>
    %4 = arith.mulf %2, %3 : vector<16x1xf32>
    %5 = vector.broadcast %4 : vector<16x1xf32> to vector<16x32xf32>
    %6 = arith.subf %0, %5 : vector<16x32xf32>
    %7 = arith.mulf %6, %6 : vector<16x32xf32>
    %cst_2 = arith.constant dense<0.000000e+00> : vector<16xf32>
    %8 = vector.multi_reduction <add>, %7, %cst_2 [1] : vector<16x32xf32> to vector<16xf32>
    %9 = vector.shape_cast %8 : vector<16xf32> to vector<16x1xf32>
    %cst_3 = arith.constant 0.0322580636 : f32
    %10 = vector.broadcast %cst_3 : f32 to vector<16x1xf32>
    %11 = arith.mulf %9, %10 : vector<16x1xf32>
    %12 = math.sqrt %11 : vector<16x1xf32>
    %cst_4 = arith.constant 9.99999997E-7 : f32
    %13 = vector.broadcast %cst_4 : f32 to vector<16x1xf32>
    %14 = arith.addf %12, %13 : vector<16x1xf32>
    %15 = tpu.reciprocal %14 : vector<16x1xf32> -> vector<16x1xf32>
    %c0_5 = arith.constant 0 : index
    %c0_6 = arith.constant 0 : index
    %16 = vector.load %arg2[%c0_5, %c0_6] : memref<1x32xf32, #tpu.memory_space<vmem>>, vector<1x32xf32>
    %17 = vector.broadcast %15 : vector<16x1xf32> to vector<16x32xf32>
    %18 = arith.mulf %6, %17 : vector<16x32xf32>
    %19 = vector.broadcast %16 : vector<1x32xf32> to vector<16x32xf32>
    %20 = arith.mulf %19, %18 : vector<16x32xf32>
    %c0_7 = arith.constant 0 : index
    %c0_8 = arith.constant 0 : index
    %21 = vector.load %arg3[%c0_7, %c0_8] : memref<1x32xf32, #tpu.memory_space<vmem>>, vector<1x32xf32>
    %22 = vector.broadcast %21 : vector<1x32xf32> to vector<16x32xf32>
    %23 = arith.addf %20, %22 : vector<16x32xf32>
    %24 = arith.truncf %23 : vector<16x32xf32> to vector<16x32xbf16>
    %c0_9 = arith.constant 0 : index
    %c0_10 = arith.constant 0 : index
    %25 = vector.load %arg4[%c0_9, %c0_10] : memref<32x32xbf16, #tpu.memory_space<vmem>>, vector<32x32xbf16>
    %cst_11 = arith.constant dense<0.000000e+00> : vector<16x32xf32>
    %26 = tpu.matmul %24, %25, %cst_11 {dimension_numbers = #tpu.dot_dimension_numbers<[1], [0], [0], [1], [0, 0, 1, 1], [], []>} : vector<16x32xbf16>, vector<32x32xbf16>, vector<16x32xf32> -> vector<16x32xf32>
    %c0_12 = arith.constant 0 : index
    %c0_13 = arith.constant 0 : index
    %27 = vector.load %arg5[%c0_12, %c0_13] : memref<1x32xf32, #tpu.memory_space<vmem>>, vector<1x32xf32>
    %28 = vector.broadcast %27 : vector<1x32xf32> to vector<16x32xf32>
    %29 = arith.addf %26, %28 : vector<16x32xf32>
    %c0_14 = arith.constant 0 : index
    %c0_15 = arith.constant 0 : index
    %30 = vector.load %arg1[%c0_14, %c0_15] : memref<16x32xf32, #tpu.memory_space<vmem>>, vector<16x32xf32>
    %31 = arith.addf %30, %29 : vector<16x32xf32>
    %c0_16 = arith.constant 0 : index
    %c0_17 = arith.constant 0 : index
    %32 = vector.load %arg6[%c0_16, %c0_17] : memref<16x32xf32, #tpu.memory_space<vmem>>, vector<16x32xf32>
    tpu.vector_store %arg6[%c0_16, %c0_17], %31 {strides = array<i32>} : memref<16x32xf32, #tpu.memory_space<vmem>>, vector<16x32xf32>,
    return
  }
  func.func @transform_0(%arg0: i32) -> (i32, i32) {
    %c0_i32 = arith.constant 0 : i32
    %c0_i32_0 = arith.constant 0 : i32
    return %arg0, %c0_i32 : i32, i32
  }
  func.func @transform_1(%arg0: i32) -> (i32, i32) {
    %c0_i32 = arith.constant 0 : i32
    %c0_i32_0 = arith.constant 0 : i32
    %c0_i32_1 = arith.constant 0 : i32
    return %c0_i32, %c0_i32_0 : i32, i32
  }
  func.func @transform_2(%arg0: i32) -> (i32, i32) {
    %c0_i32 = arith.constant 0 : i32
    %c0_i32_0 = arith.constant 0 : i32
    %c0_i32_1 = arith.constant 0 : i32
    return %c0_i32, %c0_i32_0 : i32, i32
  }
  func.func @transform_3(%arg0: i32) -> (i32, i32) {
    %c0_i32 = arith.constant 0 : i32
    %c0_i32_0 = arith.constant 0 : i32
    %c0_i32_1 = arith.constant 0 : i32
    return %c0_i32, %c0_i32_0 : i32, i32
  }
  func.func @transform_4(%arg0: i32) -> (i32, i32) {
    %c0_i32 = arith.constant 0 : i32
    %c0_i32_0 = arith.constant 0 : i32
    %c0_i32_1 = arith.constant 0 : i32
    return %c0_i32, %c0_i32_0 : i32, i32
  }
  func.func @transform_5(%arg0: i32) -> (i32, i32) {
    %c0_i32 = arith.constant 0 : i32
    %c0_i32_0 = arith.constant 0 : i32
    return %arg0, %c0_i32 : i32, i32
  }
}

module attributes {stable_mosaic.version = 11 : i64} {
  func.func @_fused_kernel(%arg0: i32, %arg1: memref<16x32xf32, #tpu.memory_space<vmem>>, %arg2: memref<1x32xf32, #tpu.memory_space<vmem>>, %arg3: memref<1x32xf32, #tpu.memory_space<vmem>>, %arg4: memref<32x32xbf16, #tpu.memory_space<vmem>>, %arg5: memref<1x32xf32, #tpu.memory_space<vmem>>, %arg6: memref<16x32xf32, #tpu.memory_space<vmem>>) attributes {dimension_semantics = [#tpu.dimension_semantics<parallel>], iteration_bounds = array<i64: 1>, scalar_prefetch = 0 : i64, scratch_operands = 0 : i64, tpu.core_type = #tpu.core_type<tc>, window_params = [{transform_indices = @transform_0, window_bounds = array<i64: 16, 32>}, {pipeline_mode = #tpu.pipeline_mode<synchronous>, transform_indices = @transform_1, window_bounds = array<i64: 1, 32>}, {pipeline_mode = #tpu.pipeline_mode<synchronous>, transform_indices = @transform_2, window_bounds = array<i64: 1, 32>}, {pipeline_mode = #tpu.pipeline_mode<synchronous>, transform_indices = @transform_3, window_bounds = array<i64: 32, 32>}, {pipeline_mode = #tpu.pipeline_mode<synchronous>, transform_indices = @transform_4, window_bounds = array<i64: 1, 32>}, {transform_indices = @transform_5, window_bounds = array<i64: 16, 32>}]} {
    %c0 = arith.constant 0 : index
    %c0_0 = arith.constant 0 : index
    %0 = vector.load %arg1[%c0, %c0_0] : memref<16x32xf32, #tpu.memory_space<vmem>>, vector<16x32xf32>
    %cst = arith.constant dense<0.000000e+00> : vector<16xf32>
    %1 = vector.multi_reduction <add>, %0, %cst [1] : vector<16x32xf32> to vector<16xf32>
    %2 = vector.shape_cast %1 : vector<16xf32> to vector<16x1xf32>
    %cst_1 = arith.constant 3.125000e-02 : f32
    %3 = vector.broadcast %cst_1 : f32 to vector<16x1xf32>
    %4 = arith.mulf %2, %3 : vector<16x1xf32>
    %5 = vector.broadcast %4 : vector<16x1xf32> to vector<16x32xf32>
    %6 = arith.subf %0, %5 : vector<16x32xf32>
    %7 = arith.mulf %6, %6 : vector<16x32xf32>
    %cst_2 = arith.constant dense<0.000000e+00> : vector<16xf32>
    %8 = vector.multi_reduction <add>, %7, %cst_2 [1] : vector<16x32xf32> to vector<16xf32>
    %9 = vector.shape_cast %8 : vector<16xf32> to vector<16x1xf32>
    %cst_3 = arith.constant 0.0322580636 : f32
    %10 = vector.broadcast %cst_3 : f32 to vector<16x1xf32>
    %11 = arith.mulf %9, %10 : vector<16x1xf32>
    %12 = math.sqrt %11 : vector<16x1xf32>
    %cst_4 = arith.constant 9.99999997E-7 : f32
    %13 = vector.broadcast %cst_4 : f32 to vector<16x1xf32>
    %14 = arith.addf %12, %13 : vector<16x1xf32>
    %15 = tpu.reciprocal %14 : vector<16x1xf32> -> vector<16x1xf32>
    %c0_5 = arith.constant 0 : index
    %c0_6 = arith.constant 0 : index
    %16 = vector.load %arg2[%c0_5, %c0_6] : memref<1x32xf32, #tpu.memory_space<vmem>>, vector<1x32xf32>
    %17 = vector.broadcast %15 : vector<16x1xf32> to vector<16x32xf32>
    %18 = arith.mulf %6, %17 : vector<16x32xf32>
    %19 = vector.broadcast %16 : vector<1x32xf32> to vector<16x32xf32>
    %20 = arith.mulf %19, %18 : vector<16x32xf32>
    %c0_7 = arith.constant 0 : index
    %c0_8 = arith.constant 0 : index
    %21 = vector.load %arg3[%c0_7, %c0_8] : memref<1x32xf32, #tpu.memory_space<vmem>>, vector<1x32xf32>
    %22 = vector.broadcast %21 : vector<1x32xf32> to vector<16x32xf32>
    %23 = arith.addf %20, %22 : vector<16x32xf32>
    %24 = arith.truncf %23 : vector<16x32xf32> to vector<16x32xbf16>
    %c0_9 = arith.constant 0 : index
    %c0_10 = arith.constant 0 : index
    %25 = vector.load %arg4[%c0_9, %c0_10] : memref<32x32xbf16, #tpu.memory_space<vmem>>, vector<32x32xbf16>
    %cst_11 = arith.constant dense<0.000000e+00> : vector<16x32xf32>
    %26 = tpu.matmul %24, %25, %cst_11 {dimension_numbers = #tpu.dot_dimension_numbers<[1], [0], [0], [1], [0, 0, 1, 1], [], []>} : vector<16x32xbf16>, vector<32x32xbf16>, vector<16x32xf32> -> vector<16x32xf32>
    %c0_12 = arith.constant 0 : index
    %c0_13 = arith.constant 0 : index
    %27 = vector.load %arg5[%c0_12, %c0_13] : memref<1x32xf32, #tpu.memory_space<vmem>>, vector<1x32xf32>
    %28 = vector.broadcast %27 : vector<1x32xf32> to vector<16x32xf32>
    %29 = arith.addf %26, %28 : vector<16x32xf32>
    %c0_14 = arith.constant 0 : index
    %c0_15 = arith.constant 0 : index
    %30 = vector.load %arg1[%c0_14, %c0_15] : memref<16x32xf32, #tpu.memory_space<vmem>>, vector<16x32xf32>
    %31 = arith.addf %30, %29 : vector<16x32xf32>
    %c0_16 = arith.constant 0 : index
    %c0_17 = arith.constant 0 : index
    %32 = vector.load %arg6[%c0_16, %c0_17] : memref<16x32xf32, #tpu.memory_space<vmem>>, vector<16x32xf32>
    tpu.vector_store %arg6[%c0_16, %c0_17], %31 {strides = array<i32>} : memref<16x32xf32, #tpu.memory_space<vmem>>, vector<16x32xf32>,
    return
  }
  func.func @transform_0(%arg0: i32) -> (i32, i32) {
    %c0_i32 = arith.constant 0 : i32
    %c0_i32_0 = arith.constant 0 : i32
    return %arg0, %c0_i32 : i32, i32
  }
  func.func @transform_1(%arg0: i32) -> (i32, i32) {
    %c0_i32 = arith.constant 0 : i32
    %c0_i32_0 = arith.constant 0 : i32
    %c0_i32_1 = arith.constant 0 : i32
    return %c0_i32, %c0_i32_0 : i32, i32
  }
  func.func @transform_2(%arg0: i32) -> (i32, i32) {
    %c0_i32 = arith.constant 0 : i32
    %c0_i32_0 = arith.constant 0 : i32
    %c0_i32_1 = arith.constant 0 : i32
    return %c0_i32, %c0_i32_0 : i32, i32
  }
  func.func @transform_3(%arg0: i32) -> (i32, i32) {
    %c0_i32 = arith.constant 0 : i32
    %c0_i32_0 = arith.constant 0 : i32
    %c0_i32_1 = arith.constant 0 : i32
    return %c0_i32, %c0_i32_0 : i32, i32
  }
  func.func @transform_4(%arg0: i32) -> (i32, i32) {
    %c0_i32 = arith.constant 0 : i32
    %c0_i32_0 = arith.constant 0 : i32
    %c0_i32_1 = arith.constant 0 : i32
    return %c0_i32, %c0_i32_0 : i32, i32
  }
  func.func @transform_5(%arg0: i32) -> (i32, i32) {
    %c0_i32 = arith.constant 0 : i32
    %c0_i32_0 = arith.constant 0 : i32
    return %arg0, %c0_i32 : i32, i32
  }
}

</mosaic_0001>

<bundles_post_ra>
// kernel: tpu_custom_call.1
= control target key start
LH: loop header
LB: loop body
LE: loop exit
PB: predicated region body
PF: predicated region fallthrough
CT: control target
= control target key end

     0   :  { %10 = vsyncpa [#allocation3], 0  ;;  %s441_s0 = inlined_call_operand.hbm [shape: f32[16,32], index: 0, kind: input, shape index: {}]   ;;  %s442_s1 = inlined_call_operand.hbm [shape: f32[1,32], index: 1, kind: input, shape index: {}]   ;;  %s443_s2 = inlined_call_operand.vmem [shape: f32[1,32], index: 2, kind: input, shape index: {}]   ;;  %s444_s3 = inlined_call_operand.hbm [shape: bf16[32,32], index: 3, kind: input, shape index: {}]   ;;  %s445_s4 = inlined_call_operand.vmem [shape: f32[1,32], index: 4, kind: input, shape index: {}]   ;;  %s446_s5 = inlined_call_operand.hbm [shape: f32[16,32], index: 5, kind: output, shape index: {}]  }
   0x1   :  { %11 = vsyncpa [#allocation6], 0  ;;  %s31_s20 = sshll.u32 %s442_s1, 4  ;;  %s32_s20 = int_to_ptr.hbm [resolvable:$true] %s31_s20 }
   0x2   :  { %12 = vsyncpa [#allocation4], 0  ;;  %s352_s21 = smov [#allocation5]   ;;  %s17_s25 = sshll.u32 %s441_s0, 4  ;;  %s18_s25 = int_to_ptr.hbm [resolvable:$true] %s17_s25 }
   0x3   :  { %s33_s22 = sshll.u32 %s352_s21, 4  ;;  %s353_s26 = smov [#allocation2]   ;;  %s34_s22 = int_to_ptr.vmem [resolvable:$true] %s33_s22 }
   0x4   :  { %36 = dma.hbm_to_vmem [thread:$0]  %s32_s20, 16, %s34_s22, [#allocation6]  }
   0x5   :  { %s19_s27 = sshll.u32 %s353_s26, 4  ;;  %s354_s28 = smov 128   ;;  %s20_s27 = int_to_ptr.vmem [resolvable:$true] %s19_s27 }
   0x6   :  { %s355_s29 = smov 8   ;;  %s43_s6 = sshll.u32 %s444_s3, 4  ;;  %s44_s6 = int_to_ptr.hbm [resolvable:$true] %s43_s6 }
   0x7   :  { %25 = dma.hbm_to_vmem [thread:$0]  %s18_s25, 256, %s20_s27, [#allocation3], %s354_s28, %s354_s28, %s355_s29  }
   0x8   :  { %s356_s7 = smov [#allocation7]   ;;  %s357_s0 = smov 64  }
   0x9   :  { %s45_s8 = sshll.u32 %s356_s7, 4  ;;  %s358_s9 = smov 4   ;;  %s46_s8 = int_to_ptr.vmem [resolvable:$true] %s45_s8 }
   0xa   :  { %51 = dma.hbm_to_vmem [thread:$0]  %s44_s6, 256, %s46_s8, [#allocation6], %s357_s0, %s357_s0, %s358_s9  }
   0xb   :  { %346 = dma.done.wait [#allocation3], 256  }
   0xc   :  { %347 = vsyncadd [#allocation3], 4294967040 }
   0xd   :  { %348 = dma.done.wait [#allocation6], 272  }
   0xe   :  { %349 = vsyncadd [#allocation6], 4294967024  ;;  %vm69_vm0 = vcmask 261120   ;;  %v402_v0 = vld [vmem:[#allocation2] sm:$0xff]  ;;  %v406_v2 = vld [vmem:[#allocation2 + $0x8] sm:$0xff]  ;;  %s359_s13 = smov [#allocation8]  }
   0xf   :  { %v70_v1 = vsel %vm69_vm0, %v402_v0, 0.0  ;;  %v73_v3 = vsel %vm69_vm0, %v406_v2, 0.0  ;;  %v230_v14 = vld [vmem:[#allocation7 + $0x8] sm:$0xff]  ;;  %v229_v16 = vld [vmem:[#allocation7] sm:$0xff]  ;;  %v239_v60 = vld [vmem:[#allocation5] ss:$0 sm:$0xff] }
  0x10   :  { %71 = vadd.xlane.f32.xlu0 %v70_v1  ;;  %188 = vmatpush.bf16.msra.mxu0 %v230_v14  ;;  %s204_s14 = sshll.u32 %s359_s13, 4  ;;  %s206_s16 = sshll.u32 %s446_s5, 4  ;;  %s205_s14 = int_to_ptr.vmem [resolvable:$true] %s204_s14  ;;  %s207_s16 = int_to_ptr.hbm [resolvable:$true] %s206_s16 }
  0x14   :  { %189 = vmatpush.bf16.msra.mxu0 %v229_v16 }
  0x18   :  { %74 = vadd.xlane.f32.xlu0 %v73_v3 }
  0x83   :  { %v72_v4 = vpop.xlane.xlu0 %71 }
  0x84   :  { %v76_v5 = vmul.f32 0.03125, %v72_v4  ;;  %v240_v4 = vld [vmem:[%s443_s2] ss:$0 sm:$0xff] }
  0x86   :  { %v411_v6 = vsub.f32 %v402_v0, %v76_v5 }
  0x88   :  { %v80_v7 = vmul.f32 %v411_v6, %v411_v6 }
  0x8a   :  { %v82_v8 = vsel %vm69_vm0, %v80_v7, 0.0 }
  0x8b   :  { %83 = vadd.xlane.f32.xlu1 %v82_v8  ;;  %v75_v9 = vpop.xlane.xlu0 %74 }
  0x8c   :  { %v77_v10 = vmul.f32 0.03125, %v75_v9 }
  0x8e   :  { %v417_v11 = vsub.f32 %v406_v2, %v77_v10 }
  0x90   :  { %v81_v12 = vmul.f32 %v417_v11, %v417_v11 }
  0x92   :  { %v85_v13 = vsel %vm69_vm0, %v81_v12, 0.0 }
  0x93   :  { %86 = vadd.xlane.f32.xlu1 %v85_v13 }
  0xfe   :  { %v84_v15 = vpop.xlane.xlu1 %83 }
  0xff   :  { %v88_v17 = vmul.f32 0.032258064, %v84_v15 }
 0x101   :  { %242 = vrsqrt.f32 %v88_v17  ;;  %vm97_vm1 = vcmp.eq.f32.partialorder %v88_v17, inf  ;;  %v100_v30 = vand.u32 2147483648, %v88_v17  ;;  %vm99_vm2 = vcmp.eq.f32.partialorder %v88_v17, 0.0 }
 0x106   :  { %v87_v18 = vpop.xlane.xlu1 %86 }
 0x107   :  { %v243_v19 = vpop.eup %242  ;;  %v89_v20 = vmul.f32 0.032258064, %v87_v18 }
 0x108   :  { %v91_v21 = vmul.f32 %v243_v19, %v88_v17 }
 0x109   :  { %244 = vrsqrt.f32 %v89_v20  ;;  %vm109_vm3 = vcmp.eq.f32.partialorder %v89_v20, inf  ;;  %v112_v38 = vand.u32 2147483648, %v89_v20  ;;  %vm111_vm4 = vcmp.eq.f32.partialorder %v89_v20, 0.0 }
 0x10a   :  { %v92_v22 = vmul.f32 %v243_v19, %v91_v21 }
 0x10c   :  { %v93_v23 = vmul.f32 0.5, %v92_v22 }
 0x10e   :  { %v94_v24 = vsub.f32 1.5, %v93_v23 }
 0x10f   :  { %v245_v25 = vpop.eup %244 }
 0x110   :  { %v95_v26 = vmul.f32 %v243_v19, %v94_v24  ;;  %v103_v27 = vmul.f32 %v245_v25, %v89_v20 }
 0x112   :  { %v96_v28 = vmul.f32 %v95_v26, %v88_v17  ;;  %v104_v29 = vmul.f32 %v245_v25, %v103_v27 }
 0x114   :  { %v98_v31 = vsel %vm97_vm1, %v88_v17, %v96_v28  ;;  %v105_v32 = vmul.f32 0.5, %v104_v29 }
 0x115   :  { %v101_v33 = vsel %vm99_vm2, %v100_v30, %v98_v31 }
 0x116   :  { %v106_v34 = vsub.f32 1.5, %v105_v32  ;;  %v114_v35 = vadd.f32 1e-06, %v101_v33 }
 0x118   :  { %v107_v36 = vmul.f32 %v245_v25, %v106_v34  ;;  %246 = vrcp.f32 %v114_v35  ;;  %v127_v46 = vand.u32 2147483648, %v114_v35  ;;  %vm121_vm6 = vweird.f32 %v114_v35 }
 0x119   :  { %v125_v48 = vand.u32 2147483647, %v114_v35 }
 0x11a   :  { %v108_v37 = vmul.f32 %v107_v36, %v89_v20  ;;  %v128_v52 = vor.u32 1.1754944e-38, %v127_v46 }
 0x11b   :  { %vm126_vm8 = vcmp.eq.f32.partialorder %v125_v48, 8.507059e+37 }
 0x11c   :  { %v110_v39 = vsel %vm109_vm3, %v89_v20, %v108_v37 }
 0x11d   :  { %v113_v40 = vsel %vm111_vm4, %v112_v38, %v110_v39 }
 0x11e   :  { %v247_v41 = vpop.eup %246  ;;  %v115_v42 = vadd.f32 1e-06, %v113_v40 }
 0x11f   :  { %v117_v43 = vmul.f32 %v247_v41, %v114_v35  ;;  %vm122_vm5 = vweird.f32 %v247_v41 }
 0x120   :  { %248 = vrcp.f32 %v115_v42  ;;  %vm123_vm7 = vmor %vm121_vm6, %vm122_vm5  ;;  %v141_v55 = vand.u32 2147483648, %v115_v42  ;;  %v139_v57 = vand.u32 2147483647, %v115_v42  ;;  %vm135_vm10 = vweird.f32 %v115_v42 }
 0x121   :  { %v118_v44 = vsub.f32 1.0, %v117_v43 }
 0x122   :  { %v142_v61 = vor.u32 1.1754944e-38, %v141_v55  ;;  %vm140_vm12 = vcmp.eq.f32.partialorder %v139_v57, 8.507059e+37 }
 0x123   :  { %v119_v45 = vmul.f32 %v247_v41, %v118_v44 }
 0x125   :  { %v120_v47 = vadd.f32 %v247_v41, %v119_v45 }
 0x126   :  { %v249_v49 = vpop.eup %248 }
 0x127   :  { %v124_v50 = vsel %vm123_vm7, %v247_v41, %v120_v47  ;;  %v131_v51 = vmul.f32 %v249_v49, %v115_v42  ;;  %vm136_vm9 = vweird.f32 %v249_v49 }
 0x128   :  { %v129_v54 = vsel %vm126_vm8, %v128_v52, %v124_v50  ;;  %vm137_vm11 = vmor %vm135_vm10, %vm136_vm9 }
 0x129   :  { %v132_v53 = vsub.f32 1.0, %v131_v51  ;;  %v145_v59 = vmul.f32 %v129_v54, %v411_v6  ;;  %v241_v6 = vld [vmem:[%s445_s4] ss:$0 sm:$0xff] }
 0x12b   :  { %v133_v56 = vmul.f32 %v249_v49, %v132_v53  ;;  %v150_v3 = vmul.f32 %v239_v60, %v145_v59 }
 0x12d   :  { %v134_v58 = vadd.f32 %v249_v49, %v133_v56  ;;  %v156_v7 = vadd.f32 %v240_v4, %v150_v3 }
 0x12f   :  { %v138_v62 = vsel %vm137_vm11, %v249_v49, %v134_v58 }
 0x130   :  { %v143_v63 = vsel %vm140_vm12, %v142_v61, %v138_v62 }
 0x131   :  { %v146_v1 = vmul.f32 %v143_v63, %v417_v11 }
 0x133   :  { %v151_v5 = vmul.f32 %v239_v60, %v146_v1 }
 0x135   :  { %v157_v8 = vadd.f32 %v240_v4, %v151_v5 }
 0x137   :  { %v158_v9 = vpack.c.bf16 %v157_v8, %v156_v7 }
 0x139   :  { %228 = vmatmul.msk.bf16.vlgmr.msra.gmra.mxu0 %vm69_vm0, %v158_v9 }
 0x1b6   :  { %v191_v10 = vpop.f32.mrf.mxu0 }
 0x1b7   :  { %v192_v12 = vadd.f32 %v241_v6, %v191_v10 }
 0x1b9   :  { %v196_v13 = vadd.f32 %v192_v12, %v402_v0 }
 0x1bb   :  { %198 = vst.msk [vmem:[#allocation8] sm:$0xff] %vm69_vm0, %v196_v13 }
 0x1be   :  { %v193_v11 = vpop.f32.mrf.mxu0 }
 0x1bf   :  { %v194_v14 = vadd.f32 %v241_v6, %v193_v11 }
 0x1c1   :  { %v197_v15 = vadd.f32 %v194_v14, %v406_v2 }
 0x1c3   :  { %199 = vst.msk [vmem:[#allocation8 + $0x8] sm:$0xff] %vm69_vm0, %v197_v15 }
 0x1c4   :  { %212 = dma.vmem_to_hbm [thread:$0]  %s205_s14, 256, %s207_s16, [#allocation4], %s354_s28, %s354_s28, %s355_s29  }
 0x1c5   :  { %350 = dma.done.wait [#allocation4], 256  }
 0x1c6   :  { %351 = vsyncadd [#allocation4], 4294967040 }
 0x1c7   :  { %217 = vsyncpa [#allocation3], 1 }
 0x1c8   :  { %218 = vsyncpa [#allocation6], 1 }
 0x1c9   :  { %219 = vsyncpa [#allocation4], 1 }

// kernel: tpu_custom_call.1
= control target key start
LH: loop header
LB: loop body
LE: loop exit
PB: predicated region body
PF: predicated region fallthrough
CT: control target
= control target key end

     0   :  { %10 = vsyncpa [#allocation3], 0  ;;  %s441_s0 = inlined_call_operand.hbm [shape: f32[16,32], index: 0, kind: input, shape index: {}]   ;;  %s442_s1 = inlined_call_operand.hbm [shape: f32[1,32], index: 1, kind: input, shape index: {}]   ;;  %s443_s2 = inlined_call_operand.vmem [shape: f32[1,32], index: 2, kind: input, shape index: {}]   ;;  %s444_s3 = inlined_call_operand.hbm [shape: bf16[32,32], index: 3, kind: input, shape index: {}]   ;;  %s445_s4 = inlined_call_operand.vmem [shape: f32[1,32], index: 4, kind: input, shape index: {}]   ;;  %s446_s5 = inlined_call_operand.hbm [shape: f32[16,32], index: 5, kind: output, shape index: {}]  }
   0x1   :  { %11 = vsyncpa [#allocation6], 0  ;;  %s31_s20 = sshll.u32 %s442_s1, 4  ;;  %s32_s20 = int_to_ptr.hbm [resolvable:$true] %s31_s20 }
   0x2   :  { %12 = vsyncpa [#allocation4], 0  ;;  %s352_s21 = smov [#allocation5]   ;;  %s17_s25 = sshll.u32 %s441_s0, 4  ;;  %s18_s25 = int_to_ptr.hbm [resolvable:$true] %s17_s25 }
   0x3   :  { %s33_s22 = sshll.u32 %s352_s21, 4  ;;  %s353_s26 = smov [#allocation2]   ;;  %s34_s22 = int_to_ptr.vmem [resolvable:$true] %s33_s22 }
   0x4   :  { %36 = dma.hbm_to_vmem [thread:$0]  %s32_s20, 16, %s34_s22, [#allocation6]  }
   0x5   :  { %s19_s27 = sshll.u32 %s353_s26, 4  ;;  %s354_s28 = smov 128   ;;  %s20_s27 = int_to_ptr.vmem [resolvable:$true] %s19_s27 }
   0x6   :  { %s355_s29 = smov 8   ;;  %s43_s6 = sshll.u32 %s444_s3, 4  ;;  %s44_s6 = int_to_ptr.hbm [resolvable:$true] %s43_s6 }
   0x7   :  { %25 = dma.hbm_to_vmem [thread:$0]  %s18_s25, 256, %s20_s27, [#allocation3], %s354_s28, %s354_s28, %s355_s29  }
   0x8   :  { %s356_s7 = smov [#allocation7]   ;;  %s357_s0 = smov 64  }
   0x9   :  { %s45_s8 = sshll.u32 %s356_s7, 4  ;;  %s358_s9 = smov 4   ;;  %s46_s8 = int_to_ptr.vmem [resolvable:$true] %s45_s8 }
   0xa   :  { %51 = dma.hbm_to_vmem [thread:$0]  %s44_s6, 256, %s46_s8, [#allocation6], %s357_s0, %s357_s0, %s358_s9  }
   0xb   :  { %346 = dma.done.wait [#allocation3], 256  }
   0xc   :  { %347 = vsyncadd [#allocation3], 4294967040 }
   0xd   :  { %348 = dma.done.wait [#allocation6], 272  }
   0xe   :  { %349 = vsyncadd [#allocation6], 4294967024  ;;  %vm69_vm0 = vcmask 261120   ;;  %v402_v0 = vld [vmem:[#allocation2] sm:$0xff]  ;;  %v406_v2 = vld [vmem:[#allocation2 + $0x8] sm:$0xff]  ;;  %s359_s13 = smov [#allocation8]  }
   0xf   :  { %v70_v1 = vsel %vm69_vm0, %v402_v0, 0.0  ;;  %v73_v3 = vsel %vm69_vm0, %v406_v2, 0.0  ;;  %v230_v14 = vld [vmem:[#allocation7 + $0x8] sm:$0xff]  ;;  %v229_v16 = vld [vmem:[#allocation7] sm:$0xff]  ;;  %v239_v60 = vld [vmem:[#allocation5] ss:$0 sm:$0xff] }
  0x10   :  { %71 = vadd.xlane.f32.xlu0 %v70_v1  ;;  %188 = vmatpush.bf16.msra.mxu0 %v230_v14  ;;  %s204_s14 = sshll.u32 %s359_s13, 4  ;;  %s206_s16 = sshll.u32 %s446_s5, 4  ;;  %s205_s14 = int_to_ptr.vmem [resolvable:$true] %s204_s14  ;;  %s207_s16 = int_to_ptr.hbm [resolvable:$true] %s206_s16 }
  0x14   :  { %189 = vmatpush.bf16.msra.mxu0 %v229_v16 }
  0x18   :  { %74 = vadd.xlane.f32.xlu0 %v73_v3 }
  0x83   :  { %v72_v4 = vpop.xlane.xlu0 %71 }
  0x84   :  { %v76_v5 = vmul.f32 0.03125, %v72_v4  ;;  %v240_v4 = vld [vmem:[%s443_s2] ss:$0 sm:$0xff] }
  0x86   :  { %v411_v6 = vsub.f32 %v402_v0, %v76_v5 }
  0x88   :  { %v80_v7 = vmul.f32 %v411_v6, %v411_v6 }
  0x8a   :  { %v82_v8 = vsel %vm69_vm0, %v80_v7, 0.0 }
  0x8b   :  { %83 = vadd.xlane.f32.xlu1 %v82_v8  ;;  %v75_v9 = vpop.xlane.xlu0 %74 }
  0x8c   :  { %v77_v10 = vmul.f32 0.03125, %v75_v9 }
  0x8e   :  { %v417_v11 = vsub.f32 %v406_v2, %v77_v10 }
  0x90   :  { %v81_v12 = vmul.f32 %v417_v11, %v417_v11 }
  0x92   :  { %v85_v13 = vsel %vm69_vm0, %v81_v12, 0.0 }
  0x93   :  { %86 = vadd.xlane.f32.xlu1 %v85_v13 }
  0xfe   :  { %v84_v15 = vpop.xlane.xlu1 %83 }
  0xff   :  { %v88_v17 = vmul.f32 0.032258064, %v84_v15 }
 0x101   :  { %242 = vrsqrt.f32 %v88_v17  ;;  %vm97_vm1 = vcmp.eq.f32.partialorder %v88_v17, inf  ;;  %v100_v30 = vand.u32 2147483648, %v88_v17  ;;  %vm99_vm2 = vcmp.eq.f32.partialorder %v88_v17, 0.0 }
 0x106   :  { %v87_v18 = vpop.xlane.xlu1 %86 }
 0x107   :  { %v243_v19 = vpop.eup %242  ;;  %v89_v20 = vmul.f32 0.032258064, %v87_v18 }
 0x108   :  { %v91_v21 = vmul.f32 %v243_v19, %v88_v17 }
 0x109   :  { %244 = vrsqrt.f32 %v89_v20  ;;  %vm109_vm3 = vcmp.eq.f32.partialorder %v89_v20, inf  ;;  %v112_v38 = vand.u32 2147483648, %v89_v20  ;;  %vm111_vm4 = vcmp.eq.f32.partialorder %v89_v20, 0.0 }
 0x10a   :  { %v92_v22 = vmul.f32 %v243_v19, %v91_v21 }
 0x10c   :  { %v93_v23 = vmul.f32 0.5, %v92_v22 }
 0x10e   :  { %v94_v24 = vsub.f32 1.5, %v93_v23 }
 0x10f   :  { %v245_v25 = vpop.eup %244 }
 0x110   :  { %v95_v26 = vmul.f32 %v243_v19, %v94_v24  ;;  %v103_v27 = vmul.f32 %v245_v25, %v89_v20 }
 0x112   :  { %v96_v28 = vmul.f32 %v95_v26, %v88_v17  ;;  %v104_v29 = vmul.f32 %v245_v25, %v103_v27 }
 0x114   :  { %v98_v31 = vsel %vm97_vm1, %v88_v17, %v96_v28  ;;  %v105_v32 = vmul.f32 0.5, %v104_v29 }
 0x115   :  { %v101_v33 = vsel %vm99_vm2, %v100_v30, %v98_v31 }
 0x116   :  { %v106_v34 = vsub.f32 1.5, %v105_v32  ;;  %v114_v35 = vadd.f32 1e-06, %v101_v33 }
 0x118   :  { %v107_v36 = vmul.f32 %v245_v25, %v106_v34  ;;  %246 = vrcp.f32 %v114_v35  ;;  %v127_v46 = vand.u32 2147483648, %v114_v35  ;;  %vm121_vm6 = vweird.f32 %v114_v35 }
 0x119   :  { %v125_v48 = vand.u32 2147483647, %v114_v35 }
 0x11a   :  { %v108_v37 = vmul.f32 %v107_v36, %v89_v20  ;;  %v128_v52 = vor.u32 1.1754944e-38, %v127_v46 }
 0x11b   :  { %vm126_vm8 = vcmp.eq.f32.partialorder %v125_v48, 8.507059e+37 }
 0x11c   :  { %v110_v39 = vsel %vm109_vm3, %v89_v20, %v108_v37 }
 0x11d   :  { %v113_v40 = vsel %vm111_vm4, %v112_v38, %v110_v39 }
 0x11e   :  { %v247_v41 = vpop.eup %246  ;;  %v115_v42 = vadd.f32 1e-06, %v113_v40 }
 0x11f   :  { %v117_v43 = vmul.f32 %v247_v41, %v114_v35  ;;  %vm122_vm5 = vweird.f32 %v247_v41 }
 0x120   :  { %248 = vrcp.f32 %v115_v42  ;;  %vm123_vm7 = vmor %vm121_vm6, %vm122_vm5  ;;  %v141_v55 = vand.u32 2147483648, %v115_v42  ;;  %v139_v57 = vand.u32 2147483647, %v115_v42  ;;  %vm135_vm10 = vweird.f32 %v115_v42 }
 0x121   :  { %v118_v44 = vsub.f32 1.0, %v117_v43 }
 0x122   :  { %v142_v61 = vor.u32 1.1754944e-38, %v141_v55  ;;  %vm140_vm12 = vcmp.eq.f32.partialorder %v139_v57, 8.507059e+37 }
 0x123   :  { %v119_v45 = vmul.f32 %v247_v41, %v118_v44 }
 0x125   :  { %v120_v47 = vadd.f32 %v247_v41, %v119_v45 }
 0x126   :  { %v249_v49 = vpop.eup %248 }
 0x127   :  { %v124_v50 = vsel %vm123_vm7, %v247_v41, %v120_v47  ;;  %v131_v51 = vmul.f32 %v249_v49, %v115_v42  ;;  %vm136_vm9 = vweird.f32 %v249_v49 }
 0x128   :  { %v129_v54 = vsel %vm126_vm8, %v128_v52, %v124_v50  ;;  %vm137_vm11 = vmor %vm135_vm10, %vm136_vm9 }
 0x129   :  { %v132_v53 = vsub.f32 1.0, %v131_v51  ;;  %v145_v59 = vmul.f32 %v129_v54, %v411_v6  ;;  %v241_v6 = vld [vmem:[%s445_s4] ss:$0 sm:$0xff] }
 0x12b   :  { %v133_v56 = vmul.f32 %v249_v49, %v132_v53  ;;  %v150_v3 = vmul.f32 %v239_v60, %v145_v59 }
 0x12d   :  { %v134_v58 = vadd.f32 %v249_v49, %v133_v56  ;;  %v156_v7 = vadd.f32 %v240_v4, %v150_v3 }
 0x12f   :  { %v138_v62 = vsel %vm137_vm11, %v249_v49, %v134_v58 }
 0x130   :  { %v143_v63 = vsel %vm140_vm12, %v142_v61, %v138_v62 }
 0x131   :  { %v146_v1 = vmul.f32 %v143_v63, %v417_v11 }
 0x133   :  { %v151_v5 = vmul.f32 %v239_v60, %v146_v1 }
 0x135   :  { %v157_v8 = vadd.f32 %v240_v4, %v151_v5 }
 0x137   :  { %v158_v9 = vpack.c.bf16 %v157_v8, %v156_v7 }
 0x139   :  { %228 = vmatmul.msk.bf16.vlgmr.msra.gmra.mxu0 %vm69_vm0, %v158_v9 }
 0x1b6   :  { %v191_v10 = vpop.f32.mrf.mxu0 }
 0x1b7   :  { %v192_v12 = vadd.f32 %v241_v6, %v191_v10 }
 0x1b9   :  { %v196_v13 = vadd.f32 %v192_v12, %v402_v0 }
 0x1bb   :  { %198 = vst.msk [vmem:[#allocation8] sm:$0xff] %vm69_vm0, %v196_v13 }
 0x1be   :  { %v193_v11 = vpop.f32.mrf.mxu0 }
 0x1bf   :  { %v194_v14 = vadd.f32 %v241_v6, %v193_v11 }
 0x1c1   :  { %v197_v15 = vadd.f32 %v194_v14, %v406_v2 }
 0x1c3   :  { %199 = vst.msk [vmem:[#allocation8 + $0x8] sm:$0xff] %vm69_vm0, %v197_v15 }
 0x1c4   :  { %212 = dma.vmem_to_hbm [thread:$0]  %s205_s14, 256, %s207_s16, [#allocation4], %s354_s28, %s354_s28, %s355_s29  }
 0x1c5   :  { %350 = dma.done.wait [#allocation4], 256  }
 0x1c6   :  { %351 = vsyncadd [#allocation4], 4294967040 }
 0x1c7   :  { %217 = vsyncpa [#allocation3], 1 }
 0x1c8   :  { %218 = vsyncpa [#allocation6], 1 }
 0x1c9   :  { %219 = vsyncpa [#allocation4], 1 }

</bundles_post_ra>
